<compile_context>
chip_gen: v7x
topology: tpu7x:2x2x1
jax: 0.10.0
libtpu: 0.0.40
codegen_flags: <defaults>
</compile_context>

<pallas_src>
import functools

import jax
import jax.numpy as jnp
from jax.experimental import pallas as pl
from jax.experimental.pallas import tpu as pltpu

LANE = 128                        # vreg lane width: last dim of the 2-D slab
MAX_BLOCK_BYTES = 4 * 1024 * 1024   # per VMEM buffer (4 buffers live -> 16 MiB)
MIN_BLOCK_BYTES = 256 * 1024        # never split below ~256 KiB blocks
TARGET_STEPS = 8                    # aim-for grid length on big arrays
VMEM_LIMIT_BYTES = 48 * 1024 * 1024 # > our 16 MiB use; < v7x 64 MiB physical


def _round_up(x, m):
    return (x + m - 1) // m * m


def _sublane(dtype):
    # f32: 8 rows/vreg, bf16/f16: 16, 1-byte types: 32 (sublane packing).
    itemsize = jnp.dtype(dtype).itemsize
    return 8 * max(1, 4 // itemsize)


def _choose_block_rows(rows, dtype):
    """Pick a row-block size: big (<=4 MiB), but >=TARGET_STEPS steps when possible."""
    itemsize = jnp.dtype(dtype).itemsize
    sub = _sublane(dtype)
    row_bytes = LANE * itemsize
    max_rows = max(sub, (MAX_BLOCK_BYTES // row_bytes) // sub * sub)
    min_rows = max(sub, _round_up(MIN_BLOCK_BYTES // row_bytes, sub))
    target = _round_up(pl.cdiv(rows, TARGET_STEPS), sub)
    block_rows = int(min(max_rows, max(min_rows, target)))
    if block_rows >= rows:
        # Small input: one full-array block (full-dim block is always legal).
        block_rows = rows
    return block_rows


def _scale_kernel(x_ref, o_ref, *, scale):
    # x_ref / o_ref: (block_rows, 128) VMEM tiles.  Pure VPU elementwise work.
    x = x_ref[...]
    if x.dtype == jnp.float32:
        o_ref[...] = x * scale
    else:
        # vreg-local cast; keeps the multiply in f32 (needed on v5e for bf16).
        o_ref[...] = (x.astype(jnp.float32) * scale).astype(o_ref.dtype)


def scale_forward(x, scale, *, donate=False):
    """Pallas implementation of Scale.forward: returns x * scale.

    Targets floating-point activations (as in the hlb_cifar10 model); the
    multiply is done in the input dtype's value domain.
    """
    orig_shape = x.shape
    dtype = x.dtype
    scale = float(scale)

    flat = x.reshape(-1)
    n = flat.size
    padded = _round_up(n, LANE)
    if padded != n:
        # Pad only the sub-128 tail (<=127 elements), not whole row-blocks.
        flat = jnp.pad(flat, (0, padded - n))
    rows = padded // LANE
    x2d = flat.reshape(rows, LANE)

    block_rows = _choose_block_rows(rows, dtype)
    grid = (pl.cdiv(rows, block_rows),)

    out2d = pl.pallas_call(
        functools.partial(_scale_kernel, scale=scale),
        out_shape=jax.ShapeDtypeStruct((rows, LANE), dtype),
        grid_spec=pltpu.PrefetchScalarGridSpec(
            num_scalar_prefetch=0,
            grid=grid,
            in_specs=[pl.BlockSpec((block_rows, LANE), lambda i: (i, 0))],
            out_specs=pl.BlockSpec((block_rows, LANE), lambda i: (i, 0)),
        ),
        compiler_params=pltpu.CompilerParams(
            dimension_semantics=("parallel",),
            vmem_limit_bytes=VMEM_LIMIT_BYTES),
        input_output_aliases=({0: 0} if donate else {}),
    )(x2d)

    out = out2d.reshape(-1)
    if padded != n:
        out = out[:n]
    return out.reshape(orig_shape)


def _reference(x, scale):
    """Pure-JAX reference of Scale.forward."""
    return x * scale


if __name__ == "__main__":
    # Small NCHW activation, consistent with the surrounding CIFAR-10 model.
    N, C, H, W = 2, 4, 16, 16
    scale = 1.0 / 9.0   # fixed Python-float attribute, as in the module

    key = jax.random.PRNGKey(0)
    x = jax.random.normal(key, (N, C, H, W), jnp.float32)

    fwd = jax.jit(functools.partial(scale_forward, scale=scale))
    out = jax.block_until_ready(fwd(x))

    ref = _reference(x, scale)
    assert out.shape == x.shape, out.shape
    assert out.dtype == x.dtype, out.dtype
    assert jnp.allclose(out, ref, rtol=1e-6, atol=1e-6), \
        float(jnp.max(jnp.abs(out - ref)))
    print("KERNEL_OK")
</pallas_src>

<mosaic_0001>
module attributes {stable_mosaic.version = 11 : i64} {
  func.func @_scale_kernel(%arg0: i32, %arg1: memref<16x128xf32, #tpu.memory_space<vmem>>, %arg2: memref<16x128xf32, #tpu.memory_space<vmem>>) attributes {dimension_semantics = [#tpu.dimension_semantics<parallel>], iteration_bounds = array<i64: 1>, scalar_prefetch = 0 : i64, scratch_operands = 0 : i64, tpu.core_type = #tpu.core_type<tc>, window_params = [{transform_indices = @transform_0, window_bounds = array<i64: 16, 128>}, {transform_indices = @transform_1, window_bounds = array<i64: 16, 128>}]} {
    %c0 = arith.constant 0 : index
    %c0_0 = arith.constant 0 : index
    %0 = vector.load %arg1[%c0, %c0_0] : memref<16x128xf32, #tpu.memory_space<vmem>>, vector<16x128xf32>
    %cst = arith.constant 0.111111112 : f32
    %1 = vector.broadcast %cst : f32 to vector<16x128xf32>
    %2 = arith.mulf %0, %1 : vector<16x128xf32>
    %c0_1 = arith.constant 0 : index
    %c0_2 = arith.constant 0 : index
    %3 = vector.load %arg2[%c0_1, %c0_2] : memref<16x128xf32, #tpu.memory_space<vmem>>, vector<16x128xf32>
    tpu.vector_store %arg2[%c0_1, %c0_2], %2 {strides = array<i32>} : memref<16x128xf32, #tpu.memory_space<vmem>>, vector<16x128xf32>,
    return
  }
  func.func @transform_0(%arg0: i32) -> (i32, i32) {
    %c0_i32 = arith.constant 0 : i32
    %c0_i32_0 = arith.constant 0 : i32
    return %arg0, %c0_i32 : i32, i32
  }
  func.func @transform_1(%arg0: i32) -> (i32, i32) {
    %c0_i32 = arith.constant 0 : i32
    %c0_i32_0 = arith.constant 0 : i32
    return %arg0, %c0_i32 : i32, i32
  }
}

</mosaic_0001>

<bundles_post_ra>
// kernel: scale_forward.1
= control target key start
LH: loop header
LB: loop body
LE: loop exit
PB: predicated region body
PF: predicated region fallthrough
CT: control target
= control target key end

     0   :  { %s40_s0 = inlined_call_operand.vmem [shape: f32[16,128], index: 0, kind: input, shape index: {}]   ;;  %s41_s1 = inlined_call_operand.vmem [shape: f32[16,128], index: 1, kind: output, shape index: {}]  }
   0x1   :  { %v8_v0 = vld [vmem:[%s40_s0] sm:$0xff]  ;;  %v9_v1 = vld [vmem:[%s40_s0 + $0x8] sm:$0xff] }
   0x2   :  { %v10_v2 = vmul.f32 0.11111111, %v8_v0  ;;  %v11_v3 = vmul.f32 0.11111111, %v9_v1 }
   0x4   :  { %12 = vst [vmem:[%s41_s1] sm:$0xff] %v10_v2  ;;  %13 = vst [vmem:[%s41_s1 + $0x8] sm:$0xff] %v11_v3 }

</bundles_post_ra>
